<compile_context>
chip_gen: v6e
topology: v6e:2x2x1
jax: 0.10.0
libtpu: 0.0.40
codegen_flags: <defaults>
</compile_context>

<pallas_src>
import jax
import jax.numpy as jnp
from jax.experimental import pallas as pl
from jax.experimental.pallas import tpu as pltpu


def _mish_ref(x):
    # Exact mish(x) = x * tanh(softplus(x)); numerically-stable softplus. (reference only)
    sp = jnp.maximum(x, 0.0) + jnp.log1p(jnp.exp(-jnp.abs(x)))
    return x * jnp.tanh(sp)


def _mish_fast(x):
    # tanh(softplus(x)) = (e^{2x} + 2e^x) / (e^{2x} + 2e^x + 2).
    # With t = exp(-|x|):
    #   x >= 0 : (1 + 2t) / (1 + 2t + 2t^2)
    #   x <  0 : (t^2 + 2t) / (t^2 + 2t + 2)
    # Cost: 1 EUP exp + 1 near-free EUP approx reciprocal + a few VPU ops.
    t = jnp.exp(-jnp.abs(x))
    t2 = t * t
    two_t = 2.0 * t
    pos = x >= 0.0
    num = jnp.where(pos, 1.0 + two_t, t2 + two_t)
    den = jnp.where(pos, 1.0 + two_t + 2.0 * t2, t2 + two_t + 2.0)
    return x * num * pl.reciprocal(den, approx=True)


def encoder_mlp_kernel(x_ref, w1_ref, b1_ref, w2_ref, b2_ref, o_ref):
    # Hot path: two MXU matmuls + VPU/EUP elementwise Mish on one row-tile.
    x = x_ref[...]
    h = jnp.dot(x, w1_ref[...], preferred_element_type=jnp.float32) + b1_ref[...]
    h = _mish_fast(h)
    out = jnp.dot(h, w2_ref[...], preferred_element_type=jnp.float32) + b2_ref[...]
    o_ref[...] = out.astype(o_ref.dtype)


def _round_up(n, m):
    return ((n + m - 1) // m) * m


def koopman_encoder_forward(x_batch, params, *, tm=1024):
    """Pallas implementation of KoopmanAutoencoder.forward (the encoder MLP)."""
    w1, b1, w2, b2 = params["w1"], params["b1"], params["w2"], params["b2"]
    nx, hidden = w1.shape
    nz = w2.shape[1]
    assert x_batch.shape[-1] == nx

    lead_shape = x_batch.shape[:-1]
    m = 1
    for d in lead_shape:
        m *= d
    x2d = x_batch.reshape(m, nx)

    # Row tile: large (default 1024) for pipelining on big batches, shrunk (but kept a
    # multiple of 8 sublanes) for tiny batches so we don't pad excessively.
    tm_eff = min(tm, _round_up(m, 8))
    m_pad = _round_up(m, tm_eff)
    if m_pad != m:
        # Zero-pad ragged tail rows; each output row is independent, padding sliced off below.
        x2d = jnp.pad(x2d, ((0, m_pad - m), (0, 0)))
    grid = (m_pad // tm_eff,)

    cost = pl.CostEstimate(
        flops=2 * m_pad * (nx * hidden + hidden * nz),
        transcendentals=m_pad * hidden,
        bytes_accessed=4 * (m_pad * nx + nx * hidden + hidden + hidden * nz + nz + m_pad * nz),
    )

    out2d = pl.pallas_call(
        encoder_mlp_kernel,
        out_shape=jax.ShapeDtypeStruct((m_pad, nz), jnp.float32),
        grid=grid,
        in_specs=[
            pl.BlockSpec((tm_eff, nx), lambda i: (i, 0)),      # x row-tile, pipelined
            pl.BlockSpec((nx, hidden), lambda i: (0, 0)),      # W1 resident across tiles
            pl.BlockSpec((1, hidden), lambda i: (0, 0)),       # b1 resident
            pl.BlockSpec((hidden, nz), lambda i: (0, 0)),      # W2 resident
            pl.BlockSpec((1, nz), lambda i: (0, 0)),           # b2 resident
        ],
        out_specs=pl.BlockSpec((tm_eff, nz), lambda i: (i, 0)),
        compiler_params=pltpu.CompilerParams(
            dimension_semantics=("parallel",),                 # shard row tiles across v7x TCs
        ),
        cost_estimate=cost,
    )(x2d, w1, b1, w2, b2)

    return out2d[:m].reshape(*lead_shape, nz)


def init_params(key, nx, hidden, nz):
    """Deterministic synthetic init (shapes match nn.Linear(nx, hidden), nn.Linear(hidden, nz))."""
    k1, k2, k3, k4 = jax.random.split(key, 4)
    # Stored as (in, out) -- i.e. transpose of PyTorch's (out, in) weight layout.
    w1 = jax.random.normal(k1, (nx, hidden), jnp.float32) * (1.0 / jnp.sqrt(nx))
    b1 = jax.random.normal(k2, (1, hidden), jnp.float32) * 0.01
    w2 = jax.random.normal(k3, (hidden, nz), jnp.float32) * (1.0 / jnp.sqrt(hidden))
    b2 = jax.random.normal(k4, (1, nz), jnp.float32) * 0.01
    return {"w1": w1, "b1": b1, "w2": w2, "b2": b2}


def _reference_forward(x_batch, params):
    h = x_batch @ params["w1"] + params["b1"][0]
    h = _mish_ref(h)
    return h @ params["w2"] + params["b2"][0]


if __name__ == "__main__":
    # Small shapes consistent with the module: nx=16, nu=4, nz=32, H=8, hidden_dims=[64].
    nx, nz, H, hidden = 16, 32, 8, 64
    B = 2

    key = jax.random.PRNGKey(0)
    kx, kp = jax.random.split(key)
    x_batch = jax.random.normal(kx, (B, H + 1, nx), jnp.float32)
    params = init_params(kp, nx, hidden, nz)

    z_vals = koopman_encoder_forward(x_batch, params)
    z_vals = jax.block_until_ready(z_vals)

    # Sanity check against a pure-JAX reference of the same math (exact mish).
    # Tolerance widened slightly vs 1e-5 because the kernel uses the EUP approx
    # reciprocal inside mish (~1e-4-level relative error).
    z_ref = _reference_forward(x_batch, params)
    assert z_vals.shape == (B, H + 1, nz)
    assert jnp.allclose(z_vals, z_ref, atol=5e-3, rtol=5e-3), float(
        jnp.max(jnp.abs(z_vals - z_ref))
    )

    # Also exercise a larger, ragged batch to cover the multi-tile / padded-tail path.
    xb2 = jax.random.normal(jax.random.PRNGKey(1), (7, H + 1, nx), jnp.float32)
    z2 = jax.block_until_ready(koopman_encoder_forward(xb2, params, tm=32))
    z2_ref = _reference_forward(xb2, params)
    assert z2.shape == (7, H + 1, nz)
    assert jnp.allclose(z2, z2_ref, atol=5e-3, rtol=5e-3)

    print("KERNEL_OK")
</pallas_src>

<mosaic_0001>
module attributes {stable_mosaic.version = 11 : i64} {
  func.func @encoder_mlp_kernel(%arg0: i32, %arg1: memref<24x16xf32, #tpu.memory_space<vmem>>, %arg2: memref<16x64xf32, #tpu.memory_space<vmem>>, %arg3: memref<1x64xf32, #tpu.memory_space<vmem>>, %arg4: memref<64x32xf32, #tpu.memory_space<vmem>>, %arg5: memref<1x32xf32, #tpu.memory_space<vmem>>, %arg6: memref<24x32xf32, #tpu.memory_space<vmem>>) attributes {dimension_semantics = [#tpu.dimension_semantics<parallel>], iteration_bounds = array<i64: 1>, scalar_prefetch = 0 : i64, scratch_operands = 0 : i64, tpu.core_type = #tpu.core_type<tc>, window_params = [{transform_indices = @transform_0, window_bounds = array<i64: 24, 16>}, {pipeline_mode = #tpu.pipeline_mode<synchronous>, transform_indices = @transform_1, window_bounds = array<i64: 16, 64>}, {pipeline_mode = #tpu.pipeline_mode<synchronous>, transform_indices = @transform_2, window_bounds = array<i64: 1, 64>}, {pipeline_mode = #tpu.pipeline_mode<synchronous>, transform_indices = @transform_3, window_bounds = array<i64: 64, 32>}, {pipeline_mode = #tpu.pipeline_mode<synchronous>, transform_indices = @transform_4, window_bounds = array<i64: 1, 32>}, {transform_indices = @transform_5, window_bounds = array<i64: 24, 32>}]} {
    %c0 = arith.constant 0 : index
    %c0_0 = arith.constant 0 : index
    %0 = vector.load %arg1[%c0, %c0_0] : memref<24x16xf32, #tpu.memory_space<vmem>>, vector<24x16xf32>
    %c0_1 = arith.constant 0 : index
    %c0_2 = arith.constant 0 : index
    %1 = vector.load %arg2[%c0_1, %c0_2] : memref<16x64xf32, #tpu.memory_space<vmem>>, vector<16x64xf32>
    %cst = arith.constant dense<0.000000e+00> : vector<24x64xf32>
    %2 = tpu.matmul %0, %1, %cst {dimension_numbers = #tpu.dot_dimension_numbers<[1], [0], [0], [1], [0, 0, 1, 1], [], []>} : vector<24x16xf32>, vector<16x64xf32>, vector<24x64xf32> -> vector<24x64xf32>
    %c0_3 = arith.constant 0 : index
    %c0_4 = arith.constant 0 : index
    %3 = vector.load %arg3[%c0_3, %c0_4] : memref<1x64xf32, #tpu.memory_space<vmem>>, vector<1x64xf32>
    %4 = vector.broadcast %3 : vector<1x64xf32> to vector<24x64xf32>
    %5 = arith.addf %2, %4 : vector<24x64xf32>
    %6 = math.absf %5 : vector<24x64xf32>
    %cst_5 = arith.constant 0.000000e+00 : f32
    %7 = vector.broadcast %cst_5 : f32 to vector<24x64xf32>
    %8 = arith.subf %7, %6 : vector<24x64xf32>
    %9 = math.exp %8 : vector<24x64xf32>
    %10 = arith.mulf %9, %9 : vector<24x64xf32>
    %cst_6 = arith.constant 2.000000e+00 : f32
    %11 = vector.broadcast %cst_6 : f32 to vector<24x64xf32>
    %12 = arith.mulf %11, %9 : vector<24x64xf32>
    %cst_7 = arith.constant 0.000000e+00 : f32
    %13 = vector.broadcast %cst_7 : f32 to vector<24x64xf32>
    %14 = arith.cmpf oge, %5, %13 : vector<24x64xf32>
    %cst_8 = arith.constant 1.000000e+00 : f32
    %15 = vector.broadcast %cst_8 : f32 to vector<24x64xf32>
    %16 = arith.addf %15, %12 : vector<24x64xf32>
    %17 = arith.addf %10, %12 : vector<24x64xf32>
    %18 = arith.select %14, %16, %17 : vector<24x64xi1>, vector<24x64xf32>
    %cst_9 = arith.constant 1.000000e+00 : f32
    %19 = vector.broadcast %cst_9 : f32 to vector<24x64xf32>
    %20 = arith.addf %19, %12 : vector<24x64xf32>
    %cst_10 = arith.constant 2.000000e+00 : f32
    %21 = vector.broadcast %cst_10 : f32 to vector<24x64xf32>
    %22 = arith.mulf %21, %10 : vector<24x64xf32>
    %23 = arith.addf %20, %22 : vector<24x64xf32>
    %24 = arith.addf %10, %12 : vector<24x64xf32>
    %cst_11 = arith.constant 2.000000e+00 : f32
    %25 = vector.broadcast %cst_11 : f32 to vector<24x64xf32>
    %26 = arith.addf %24, %25 : vector<24x64xf32>
    %27 = arith.select %14, %23, %26 : vector<24x64xi1>, vector<24x64xf32>
    %28 = arith.mulf %5, %18 : vector<24x64xf32>
    %29 = tpu.reciprocal %27 {approx = true} : vector<24x64xf32> -> vector<24x64xf32>
    %30 = arith.mulf %28, %29 : vector<24x64xf32>
    %c0_12 = arith.constant 0 : index
    %c0_13 = arith.constant 0 : index
    %31 = vector.load %arg4[%c0_12, %c0_13] : memref<64x32xf32, #tpu.memory_space<vmem>>, vector<64x32xf32>
    %cst_14 = arith.constant dense<0.000000e+00> : vector<24x32xf32>
    %32 = tpu.matmul %30, %31, %cst_14 {dimension_numbers = #tpu.dot_dimension_numbers<[1], [0], [0], [1], [0, 0, 1, 1], [], []>} : vector<24x64xf32>, vector<64x32xf32>, vector<24x32xf32> -> vector<24x32xf32>
    %c0_15 = arith.constant 0 : index
    %c0_16 = arith.constant 0 : index
    %33 = vector.load %arg5[%c0_15, %c0_16] : memref<1x32xf32, #tpu.memory_space<vmem>>, vector<1x32xf32>
    %34 = vector.broadcast %33 : vector<1x32xf32> to vector<24x32xf32>
    %35 = arith.addf %32, %34 : vector<24x32xf32>
    %c0_17 = arith.constant 0 : index
    %c0_18 = arith.constant 0 : index
    %36 = vector.load %arg6[%c0_17, %c0_18] : memref<24x32xf32, #tpu.memory_space<vmem>>, vector<24x32xf32>
    tpu.vector_store %arg6[%c0_17, %c0_18], %35 {strides = array<i32>} : memref<24x32xf32, #tpu.memory_space<vmem>>, vector<24x32xf32>,
    return
  }
  func.func @transform_0(%arg0: i32) -> (i32, i32) {
    %c0_i32 = arith.constant 0 : i32
    %c0_i32_0 = arith.constant 0 : i32
    return %arg0, %c0_i32 : i32, i32
  }
  func.func @transform_1(%arg0: i32) -> (i32, i32) {
    %c0_i32 = arith.constant 0 : i32
    %c0_i32_0 = arith.constant 0 : i32
    %c0_i32_1 = arith.constant 0 : i32
    return %c0_i32, %c0_i32_0 : i32, i32
  }
  func.func @transform_2(%arg0: i32) -> (i32, i32) {
    %c0_i32 = arith.constant 0 : i32
    %c0_i32_0 = arith.constant 0 : i32
    %c0_i32_1 = arith.constant 0 : i32
    return %c0_i32, %c0_i32_0 : i32, i32
  }
  func.func @transform_3(%arg0: i32) -> (i32, i32) {
    %c0_i32 = arith.constant 0 : i32
    %c0_i32_0 = arith.constant 0 : i32
    %c0_i32_1 = arith.constant 0 : i32
    return %c0_i32, %c0_i32_0 : i32, i32
  }
  func.func @transform_4(%arg0: i32) -> (i32, i32) {
    %c0_i32 = arith.constant 0 : i32
    %c0_i32_0 = arith.constant 0 : i32
    %c0_i32_1 = arith.constant 0 : i32
    return %c0_i32, %c0_i32_0 : i32, i32
  }
  func.func @transform_5(%arg0: i32) -> (i32, i32) {
    %c0_i32 = arith.constant 0 : i32
    %c0_i32_0 = arith.constant 0 : i32
    return %arg0, %c0_i32 : i32, i32
  }
}

</mosaic_0001>

<bundles_post_ra>
// kernel: tpu_custom_call.1
= control target key start
LH: loop header
LB: loop body
LE: loop exit
PB: predicated region body
PF: predicated region fallthrough
CT: control target
= control target key end

     0   :  { %v416_v1 = vmov 0.0   ;;  %vm417_vm0 = vmmov 0   ;;  %vm33_vm1 = vcmask 130048   ;;  %s533_s0 = inlined_call_operand.vmem [shape: f32[24,16], index: 0, kind: input, shape index: {}]   ;;  %s534_s1 = inlined_call_operand.vmem [shape: f32[16,64], index: 1, kind: input, shape index: {}]   ;;  %s535_s2 = inlined_call_operand.vmem [shape: f32[1,64], index: 2, kind: input, shape index: {}]   ;;  %s536_s3 = inlined_call_operand.vmem [shape: f32[64,32], index: 3, kind: input, shape index: {}]   ;;  %s537_s4 = inlined_call_operand.vmem [shape: f32[1,32], index: 4, kind: input, shape index: {}]   ;;  %s538_s5 = inlined_call_operand.hbm [shape: f32[24,32], index: 5, kind: output, shape index: {}]  }
   0x1   :  { %v25_v0 = vld [vmem:[%s534_s1 + $0x8] sm:$0xff]  ;;  %323 = vmatprep.subr.mxu0 %v416_v1  ;;  %v24_v2 = vld [vmem:[%s534_s1] sm:$0xff]  ;;  %327 = vmatprep.mubr.msk.f32.mxu0 %vm417_vm0, %v416_v1 }
   0x2   :  { %324 = vmatpush3.msra.mxu0 %v25_v0  ;;  %v21_v3 = vld [vmem:[%s533_s0] sm:$0xff]  ;;  %361 = vmatprep.subr.mxu1 %v416_v1 }
   0x3   :  { %10 = vsyncpa [#allocation3], 0  ;;  %325 = vmatprep.subr.mxu0 %v416_v1  ;;  %355 = vmatprep.mubr.msk.f32.mxu1 %vm417_vm0, %v416_v1  ;;  %v22_v4 = vld [vmem:[%s533_s0 + $0x8] sm:$0xff]  ;;  %v23_v5 = vld [vmem:[%s533_s0 + $0x10] sm:$0xff]  ;;  %vm189_vm5 = vcmask 523264   ;;  %vm279_vm6 = vcmask 261120  }
   0x4   :  { %326 = vmatpush3.msra.mxu0 %v24_v2  ;;  %v181_v6 = vld [vmem:[%s536_s3 + $0x38] sm:$0xff]  ;;  %v180_v7 = vld [vmem:[%s536_s3 + $0x30] sm:$0xff]  ;;  %v179_v8 = vld [vmem:[%s536_s3 + $0x28] sm:$0xff]  ;;  %s418_s19 = smov [#allocation2]  }
   0x5   :  { %328 = vmatmul.mubr.msk.f32.vlgmr.msra.gmra.mxu0 %vm33_vm1, %v21_v3  ;;  %336 = vmatprep.subr.mxu0 %v416_v1  ;;  %v178_v9 = vld [vmem:[%s536_s3 + $0x20] sm:$0xff]  ;;  %v177_v10 = vld [vmem:[%s536_s3 + $0x18] sm:$0xff]  ;;  %v176_v11 = vld [vmem:[%s536_s3 + $0x10] sm:$0xff]  ;;  %s288_s20 = sshll.u32 %s418_s19, 4  ;;  %s289_s20 = int_to_ptr.vmem [resolvable:$true] %s288_s20 }
   0x6   :  { %330 = vmatprep.mubr.msk.f32.mxu0 %vm417_vm0, %v416_v1  ;;  %337 = vmatpush3.msra.mxu0 %v181_v6  ;;  %v175_v12 = vld [vmem:[%s536_s3 + $0x8] sm:$0xff]  ;;  %v174_v13 = vld [vmem:[%s536_s3] sm:$0xff]  ;;  %s394_s21 = scalar_lea.vmem %s289_s20, 384  ;;  %p399_p1 = scmp.lt.s32.totalorder %s289_s20, %s289_s20 }
   0x7   :  { %369 = vmatpush3.msra.mxu1 %v181_v6  ;;  %338 = vmatprep.subr.mxu0 %v416_v1  ;;  %v299_v14 = vld [vmem:[%s535_s2] ss:$0 sm:$0xff]  ;;  %p395_p0 = scmp.ne.s32.totalorder %s289_s20, %s394_s21  ;;  %p400_p2 = scmp.lt.s32.totalorder %s394_s21, %s394_s21 }
   0x8   :  { %362 = vmatprep.subr.mxu1 %v416_v1  ;;  %339 = vmatpush3.msra.mxu0 %v180_v7 }
   0x9   :  { %331 = vmatmul.mubr.msk.f32.gmra.mxu0 %vm33_vm1, %v22_v4  ;;  %370 = vmatpush3.msra.mxu1 %v180_v7  ;;  %p401_p3 = por %p400_p2, %p399_p1 }
   0xa   :  { %333 = vmatprep.mubr.msk.f32.mxu0 %vm417_vm0, %v416_v1  ;;  %340 = vmatprep.subr.mxu0 %v416_v1 }
   0xb   :  { %363 = vmatprep.subr.mxu1 %v416_v1  ;;  %341 = vmatpush3.msra.mxu0 %v179_v8  ;;  %p402_p4 = pnand %p401_p3, %p395_p0 }
   0xc   :  { %371 = vmatpush3.msra.mxu1 %v179_v8  ;;  %342 = vmatprep.subr.mxu0 %v416_v1 }
   0xd   :  { %334 = vmatmul.mubr.msk.f32.gmra.mxu0 %vm33_vm1, %v23_v5  ;;  %364 = vmatprep.subr.mxu1 %v416_v1 }
   0xe   :  { %352 = vmatprep.mubr.msk.f32.mxu0 %vm417_vm0, %v416_v1  ;;  %343 = vmatpush3.msra.mxu0 %v178_v9 }
   0xf   :  { %372 = vmatpush3.msra.mxu1 %v178_v9  ;;  %344 = vmatprep.subr.mxu0 %v416_v1  ;;  %v303_v9 = vld [vmem:[%s537_s4] ss:$0 sm:$0xff] }
  0x10   :  { %365 = vmatprep.subr.mxu1 %v416_v1  ;;  %345 = vmatpush3.msra.mxu0 %v177_v10 }
  0x11   :  { %373 = vmatpush3.msra.mxu1 %v177_v10  ;;  %346 = vmatprep.subr.mxu0 %v416_v1 }
  0x12   :  { %366 = vmatprep.subr.mxu1 %v416_v1  ;;  %347 = vmatpush3.msra.mxu0 %v176_v11 }
  0x13   :  { %374 = vmatpush3.msra.mxu1 %v176_v11  ;;  %348 = vmatprep.subr.mxu0 %v416_v1 }
  0x14   :  { %367 = vmatprep.subr.mxu1 %v416_v1  ;;  %349 = vmatpush3.msra.mxu0 %v175_v12 }
  0x15   :  { %375 = vmatpush3.msra.mxu1 %v175_v12  ;;  %350 = vmatprep.subr.mxu0 %v416_v1 }
  0x16   :  { %368 = vmatprep.subr.mxu1 %v416_v1  ;;  %351 = vmatpush3.msra.mxu0 %v174_v13 }
  0x17   :  { %376 = vmatpush3.msra.mxu1 %v174_v13 }
  0xc5   :  { %v109_v15 = vpop.f32.mrf.mxu0 }
  0xc6   :  { %v110_v16 = vadd.f32 %v299_v14, %v109_v15 }
  0xc7   :  { %v329_v17 = vpop.f32.mrf.mxu0 }
  0xc8   :  { %v123_v18 = vand.u32 2147483647, %v110_v16  ;;  %vm141_vm2 = vcmp.ge.f32.partialorder %v110_v16, 0.0 }
  0xc9   :  { %v114_v19 = vpop.f32.mrf.mxu0 }
  0xca   :  { %v126_v20 = vsub.f32 0.0, %v123_v18  ;;  %v115_v21 = vadd.f32 %v299_v14, %v114_v19 }
  0xcb   :  { %v332_v22 = vpop.f32.mrf.mxu0 }
  0xcc   :  { %v129_v23 = vmul.f32 1.442695, %v126_v20  ;;  %v124_v24 = vand.u32 2147483647, %v115_v21  ;;  %vm142_vm3 = vcmp.ge.f32.partialorder %v115_v21, 0.0 }
  0xcd   :  { %v119_v25 = vpop.f32.mrf.mxu0 }
  0xce   :  { %382 = vpow2.f32 %v129_v23  ;;  %v127_v26 = vsub.f32 0.0, %v124_v24  ;;  %v120_v27 = vadd.f32 %v299_v14, %v119_v25 }
  0xcf   :  { %v335_v28 = vpop.f32.mrf.mxu0 }
  0xd0   :  { %v131_v29 = vmul.f32 1.442695, %v127_v26  ;;  %v125_v30 = vand.u32 2147483647, %v120_v27  ;;  %vm143_vm4 = vcmp.ge.f32.partialorder %v120_v27, 0.0 }
  0xd2   :  { %384 = vpow2.f32 %v131_v29  ;;  %v128_v31 = vsub.f32 0.0, %v125_v30 }
  0xd4   :  { %v133_v32 = vmul.f32 1.442695, %v128_v31 }
  0xd6   :  { %386 = vpow2.f32 %v133_v32 }
  0xdb   :  { %v383_v33 = vpop.eup %382 }
  0xdc   :  { %v135_v34 = vmul.f32 %v383_v33, %v383_v33  ;;  %v138_v35 = vmul.f32 2.0, %v383_v33 }
  0xde   :  { %v144_v36 = vadd.f32 1.0, %v138_v35  ;;  %v147_v37 = vadd.f32 %v138_v35, %v135_v34  ;;  %v153_v38 = vmul.f32 2.0, %v135_v34 }
  0xdf   :  { %v385_v39 = vpop.eup %384 }
  0xe0   :  { %v156_v40 = vadd.f32 %v153_v38, %v144_v36  ;;  %v159_v41 = vadd.f32 2.0, %v147_v37  ;;  %v136_v42 = vmul.f32 %v385_v39, %v385_v39  ;;  %v139_v43 = vmul.f32 2.0, %v385_v39 }
  0xe1   :  { %v150_v60 = vsel %vm141_vm2, %v144_v36, %v147_v37 }
  0xe2   :  { %v162_v44 = vsel %vm141_vm2, %v156_v40, %v159_v41  ;;  %v154_v45 = vmul.f32 2.0, %v136_v42  ;;  %v145_v47 = vadd.f32 1.0, %v139_v43  ;;  %v148_v48 = vadd.f32 %v139_v43, %v136_v42 }
  0xe3   :  { %v387_v46 = vpop.eup %386  ;;  %388 = vrcp.f32 %v162_v44  ;;  %v165_v61 = vmul.f32 %v150_v60, %v110_v16 }
  0xe4   :  { %v137_v49 = vmul.f32 %v387_v46, %v387_v46  ;;  %v140_v50 = vmul.f32 2.0, %v387_v46  ;;  %v157_v51 = vadd.f32 %v154_v45, %v145_v47  ;;  %v160_v52 = vadd.f32 2.0, %v148_v48 }
  0xe5   :  { %v151_v0 = vsel %vm142_vm3, %v145_v47, %v148_v48 }
  0xe6   :  { %v146_v53 = vadd.f32 1.0, %v140_v50  ;;  %v149_v54 = vadd.f32 %v140_v50, %v137_v49  ;;  %v155_v55 = vmul.f32 2.0, %v137_v49  ;;  %v163_v56 = vsel %vm142_vm3, %v157_v51, %v160_v52 }
  0xe7   :  { %390 = vrcp.f32 %v163_v56  ;;  %v166_v2 = vmul.f32 %v151_v0, %v115_v21 }
  0xe8   :  { %v158_v57 = vadd.f32 %v155_v55, %v146_v53  ;;  %v161_v58 = vadd.f32 2.0, %v149_v54  ;;  %v152_v3 = vsel %vm143_vm4, %v146_v53, %v149_v54 }
  0xe9   :  { %v167_v6 = vmul.f32 %v152_v3, %v120_v27 }
  0xea   :  { %v164_v59 = vsel %vm143_vm4, %v158_v57, %v161_v58 }
  0xeb   :  { %392 = vrcp.f32 %v164_v59 }
  0xf0   :  { %v389_v62 = vpop.eup %388 }
  0xf1   :  { %v171_v63 = vmul.f32 %v389_v62, %v165_v61 }
  0xf3   :  { %353 = vmatmul.mubr.msk.f32.vlgmr.msra.gmra.mxu0 %vm189_vm5, %v171_v63 }
  0xf4   :  { %v391_v4 = vpop.eup %390 }
  0xf5   :  { %v172_v5 = vmul.f32 %v391_v4, %v166_v2 }
  0xf7   :  { %356 = vmatmul.mubr.msk.f32.vlgmr.msra.gmra.mxu1 %vm189_vm5, %v172_v5 }
  0xf8   :  { %v393_v7 = vpop.eup %392  ;;  %358 = vmatprep.mubr.msk.f32.mxu1 %vm417_vm0, %v416_v1 }
  0xf9   :  { %v173_v8 = vmul.f32 %v393_v7, %v167_v6 }
  0xfb   :  { %359 = vmatmul.mubr.msk.f32.gmra.mxu1 %vm189_vm5, %v173_v8 }
 0x1b3   :  { %v265_v10 = vpop.f32.mrf.mxu0 }
 0x1b4   :  { %v266_v11 = vadd.f32 %v303_v9, %v265_v10 }
 0x1b5   :  { %v354_v12 = vpop.f32.mrf.mxu0 }
 0x1b6   :  { %280 = vst.msk [vmem:[#allocation2] sm:$0xff] %vm279_vm6, %v266_v11 }
 0x1b7   :  { %v270_v13 = vpop.f32.mrf.mxu1 }
 0x1b8   :  { %v271_v14 = vadd.f32 %v303_v9, %v270_v13 }
 0x1b9   :  { %v357_v15 = vpop.f32.mrf.mxu1 }
 0x1ba   :  { %281 = vst.msk [vmem:[#allocation2 + $0x8] sm:$0xff] %vm279_vm6, %v271_v14 }
 0x1bb   :  { %v275_v16 = vpop.f32.mrf.mxu1 }
 0x1bc   :  { %v276_v17 = vadd.f32 %v303_v9, %v275_v16 }
 0x1bd   :  { %v360_v1 = vpop.f32.mrf.mxu1 }
 0x1be   :  { %282 = vst.msk [vmem:[#allocation2 + $0x10] sm:$0xff] %vm279_vm6, %v276_v17 }
 0x1bf   :  { %405 = shalt.err (!%p402_p4)
}
 0x1c0   :  { %s419_s4 = smov 128   ;;  %s420_s22 = smov 8  }
 0x1c1   :  { %294 = dma.vmem_to_hbm [thread:$0]  %s289_s20, 384, %s538_s5, [#allocation3], %s419_s4, %s419_s4, %s420_s22  }
 0x1c2   :  { %414 = dma.done.wait [#allocation3], 384  }
 0x1c3   :  { %415 = vsyncadd [#allocation3], 4294966912 }
 0x1c4   :  { %298 = vsyncpa [#allocation3], 1 }

</bundles_post_ra>
